<compile_context>
chip_gen: v7x
topology: tpu7x:2x2x1
jax: 0.10.0
libtpu: 0.0.40
codegen_flags: <defaults>
</compile_context>

<pallas_src>
import functools
import math

import jax
import jax.numpy as jnp
from jax.experimental import pallas as pl
from jax.experimental.pallas import tpu as pltpu

BN_EPS = 1e-5
CHANNELS = [64, 128, 256, 512, 1024]


def _tpu_vmem_bytes():
    try:
        info = pltpu.get_tpu_info()
        cap = getattr(info, "vmem_capacity_bytes", None)
        if cap:
            return int(cap)
    except Exception:
        pass
    return 64 * 1024 * 1024  # conservative (v7x per-TC) default


VMEM_CAP = _tpu_vmem_bytes()
VMEM_LIMIT = min(int(VMEM_CAP * 0.70), 100 * 1024 * 1024)
WEIGHT_RESIDENT_BYTES = VMEM_LIMIT // 2   # budget for a resident conv weight (incl. 2 buffers)

_FLAGS = {"strided": False}  # set by _probe_strided_ds() in __main__


def _pick_tile(n, cap=1024):
    if n <= cap:
        return n
    for t in (1024, 512, 256, 128, 64, 32, 16, 8):
        if t <= cap and n % t == 0:
            return t
    return n


def _largest_divisor_leq(n, cap):
    cap = max(1, min(n, cap))
    for d in range(cap, 0, -1):
        if n % d == 0:
            return d
    return 1


# ----------------------------------------------------------------------------
# Pallas kernels
# ----------------------------------------------------------------------------
def _conv3x3_kernel(*refs, H, W, act, has_add, has_res, need_vmask, upsample):
    """Fused 3x3 conv: in-VMEM patch build -> one long-K matmul -> BN shift +
    activation (+ recurrent pre-add, + RCNN residual).  Optionally folds a
    nearest-2x upsample into the patch staging (x_ref is then low-res).

    Ref order: x, [add], w(9*cin, ct), shift(1, ct), [res], out, xp, pat.
    """
    it = iter(refs)
    x_ref = next(it)
    add_ref = next(it) if has_add else None
    w_ref = next(it)
    shift_ref = next(it)
    res_ref = next(it) if has_res else None
    o_ref = next(it)
    xp_ref = next(it)
    pat_ref = next(it)

    n = pat_ref.shape[0]                       # output rows in this tile
    cin = xp_ref.shape[1]
    pad_top = xp_ref.shape[0] - n - (W + 1)    # sublane-aligned zero pad above

    @pl.when(pl.program_id(1) == 0)            # once per row tile (cout inner)
    def _stage_and_build():
        # Zero only the halo pad rows (top pad_top rows, bottom W+1 rows).
        xp_ref[:pad_top, :] = jnp.zeros((pad_top, cin), jnp.bfloat16)
        xp_ref[pad_top + n:, :] = jnp.zeros((W + 1, cin), jnp.bfloat16)

        if upsample:
            # Fold nearest-2x upsample into the staging: replicate each low-res
            # row into 2x2 high-res positions with strided VMEM writes.
            Hl, Wl = H // 2, W // 2
            n_img = n // (H * W)
            for img in range(n_img):
                for hl in range(Hl):
                    row = x_ref[img * Hl * Wl + hl * Wl:
                                img * Hl * Wl + (hl + 1) * Wl, :]
                    base = pad_top + img * H * W + (2 * hl) * W
                    xp_ref[pl.ds(base, Wl, stride=2), :] = row
                    xp_ref[pl.ds(base + 1, Wl, stride=2), :] = row
                    xp_ref[pl.ds(base + W, Wl, stride=2), :] = row
                    xp_ref[pl.ds(base + W + 1, Wl, stride=2), :] = row
        else:
            xin = x_ref[...]
            if has_add:
                xin = xin + add_ref[...]
            xp_ref[pad_top:pad_top + n, :] = xin

        # Build the (n, 9*cin) patch matrix (single long-K MXU matmul below).
        rows = jax.lax.broadcasted_iota(jnp.int32, (n, 1), 0)
        ww = rows % W
        m_left = ww >= 1
        m_right = ww < (W - 1)
        if need_vmask:
            hh = (rows // W) % H
            v_up = hh >= 1
            v_dn = hh < (H - 1)
        zero = jnp.zeros((n, cin), jnp.bfloat16)

        for k in range(9):
            dy, dx = k // 3 - 1, k % 3 - 1
            s = dy * W + dx
            slab = xp_ref[pad_top + s:pad_top + s + n, :]
            mask = None
            if dx == -1:
                mask = m_left
            elif dx == 1:
                mask = m_right
            if need_vmask:
                if dy == -1:
                    mask = v_up if mask is None else (mask & v_up)
                elif dy == 1:
                    mask = v_dn if mask is None else (mask & v_dn)
            if mask is not None:
                slab = jnp.where(mask, slab, zero)
            pat_ref[:, k * cin:(k + 1) * cin] = slab

    acc = jnp.dot(pat_ref[...], w_ref[...], preferred_element_type=jnp.float32)
    y = acc + shift_ref[...]
    if act == "relu":
        y = jnp.maximum(y, 0.0)
    if has_res:
        y = y + res_ref[...].astype(jnp.float32)
    o_ref[...] = y.astype(o_ref.dtype)


def _pointwise_kernel(*refs, n_in, act):
    """1x1 conv as matmul(s) + shift + activation.  Supports a split input
    (two operands with two weight halves, replacing the decoder concat)."""
    xs = refs[:n_in]
    ws = refs[n_in:2 * n_in]
    shift_ref = refs[2 * n_in]
    o_ref = refs[2 * n_in + 1]

    acc = jnp.dot(xs[0][...], ws[0][...], preferred_element_type=jnp.float32)
    for i in range(1, n_in):
        acc = acc + jnp.dot(xs[i][...], ws[i][...],
                            preferred_element_type=jnp.float32)
    y = acc + shift_ref[...]
    if act == "relu":
        y = jnp.maximum(y, 0.0)
    o_ref[...] = y.astype(o_ref.dtype)


def _pool_pointwise_kernel(x_ref, w_ref, shift_ref, o_ref, *, W, act):
    """2x2 maxpool fused into a 1x1 conv.  x_ref is a lane-paired re-view of
    the pre-pool activation: (rb, W, 2*C) where sublanes [0, W/2) are image row
    2h and [W/2, W) row 2h+1, and lanes pack the (even-w, odd-w) pair."""
    rb = x_ref.shape[0]
    C = x_ref.shape[2] // 2
    Wh = W // 2
    v = jnp.maximum(x_ref[:, :Wh, :], x_ref[:, Wh:, :])       # vertical max
    p = jnp.maximum(v[:, :, :C], v[:, :, C:])                 # horizontal max
    p = p.reshape(rb * Wh, C)                                 # free (Wh % 8 == 0)
    acc = jnp.dot(p, w_ref[...], preferred_element_type=jnp.float32)
    y = acc + shift_ref[...]
    if act == "relu":
        y = jnp.maximum(y, 0.0)
    o_ref[...] = y.astype(o_ref.dtype)


def _attention_kernel(g_ref, x_ref, wg_ref, wx_ref, sg_ref, sx_ref,
                      wpsi_ref, spsi_ref, o_ref):
    """Fully fused attention gate: psi stays in vregs, output is lane-dense."""
    a = (jnp.dot(g_ref[...], wg_ref[...], preferred_element_type=jnp.float32)
         + sg_ref[...]
         + jnp.dot(x_ref[...], wx_ref[...], preferred_element_type=jnp.float32)
         + sx_ref[...])
    a = jnp.maximum(a, 0.0)
    psi = jnp.sum(a * wpsi_ref[...], axis=1, keepdims=True) + spsi_ref[...]
    psi = jax.nn.sigmoid(psi)
    o_ref[...] = (x_ref[...].astype(jnp.float32) * psi).astype(o_ref.dtype)


def _max4_kernel(a_ref, b_ref, c_ref, d_ref, o_ref):
    o_ref[...] = jnp.maximum(jnp.maximum(a_ref[...], b_ref[...]),
                             jnp.maximum(c_ref[...], d_ref[...]))


# ----------------------------------------------------------------------------
# Pallas wrappers (jit-cached per shape / static-arg combination)
# ----------------------------------------------------------------------------
@functools.partial(jax.jit, static_argnames=("H", "W", "act", "upsample"))
def conv3x3(x, add, w, shift, res, *, H, W, act, upsample=False):
    """x/add: (N, Cin) bf16 (x is the low-res (N//4, Cin) tensor if upsample);
    w: (9*Cin, Cout) bf16; shift: (1, Cout) f32; res: (N, Cout) bf16 or None."""
    assert not (upsample and add is not None)
    N = x.shape[0] * 4 if upsample else x.shape[0]
    cin = w.shape[0] // 9
    cout = w.shape[1]
    hw = H * W

    if hw % 8 == 0:
        n_tile = hw                      # one image per row tile
    else:
        n_tile = N                       # tiny spatial: whole batch in one tile
    single_image = (n_tile == hw)
    need_vmask = not single_image

    w_bytes = w.size * 2                 # bf16
    if cout % 256 == 0 and 2 * w_bytes > WEIGHT_RESIDENT_BYTES:
        ct = 256                         # weight too large to keep resident
    else:
        ct = cout                        # weight resident: constant index_map
    grid = (N // n_tile, cout // ct)
    pad_top = ((W + 1 + 7) // 8) * 8

    in_specs = []
    args = []
    if upsample:
        in_specs.append(pl.BlockSpec((n_tile // 4, cin), lambda i, j: (i, 0)))
        args.append(x)
        has_add = False
    else:
        in_specs.append(pl.BlockSpec((n_tile, cin), lambda i, j: (i, 0)))
        args.append(x)
        has_add = add is not None
        if has_add:
            in_specs.append(pl.BlockSpec((n_tile, cin), lambda i, j: (i, 0)))
            args.append(add)
    in_specs += [pl.BlockSpec((9 * cin, ct), lambda i, j: (0, j)),
                 pl.BlockSpec((1, ct), lambda i, j: (0, j))]
    args += [w, shift]
    if res is not None:
        in_specs.append(pl.BlockSpec((n_tile, ct), lambda i, j: (i, j)))
        args.append(res)

    scratch = [pltpu.VMEM((pad_top + n_tile + W + 1, cin), jnp.bfloat16),
               pltpu.VMEM((n_tile, 9 * cin), jnp.bfloat16)]

    kernel = functools.partial(
        _conv3x3_kernel, H=H, W=W, act=act, has_add=has_add,
        has_res=res is not None, need_vmask=need_vmask, upsample=upsample)

    return pl.pallas_call(
        kernel,
        out_shape=jax.ShapeDtypeStruct((N, cout), jnp.bfloat16),
        grid=grid,
        in_specs=in_specs,
        out_specs=pl.BlockSpec((n_tile, ct), lambda i, j: (i, j)),
        scratch_shapes=scratch,
        compiler_params=pltpu.CompilerParams(
            dimension_semantics=("parallel", "arbitrary"),
            vmem_limit_bytes=VMEM_LIMIT),
    )(*args)


@functools.partial(jax.jit, static_argnames=("act", "out_dtype"))
def pointwise(xs, ws, shift, *, act, out_dtype):
    """1x1 conv.  xs: tuple of (N, Cin_i); ws: tuple of (Cin_i, Cout)."""
    N = xs[0].shape[0]
    cout = ws[0].shape[1]
    n_tile = _pick_tile(N, 1024)
    grid = (N // n_tile,)

    in_specs = [pl.BlockSpec((n_tile, xi.shape[1]), lambda i: (i, 0))
                for xi in xs]
    in_specs += [pl.BlockSpec((wi.shape[0], cout), lambda i: (0, 0))
                 for wi in ws]
    in_specs += [pl.BlockSpec((1, cout), lambda i: (0, 0))]

    kernel = functools.partial(_pointwise_kernel, n_in=len(xs), act=act)
    return pl.pallas_call(
        kernel,
        out_shape=jax.ShapeDtypeStruct((N, cout), out_dtype),
        grid=grid,
        in_specs=in_specs,
        out_specs=pl.BlockSpec((n_tile, cout), lambda i: (i, 0)),
        compiler_params=pltpu.CompilerParams(
            dimension_semantics=("parallel",),
            vmem_limit_bytes=VMEM_LIMIT),
    )(*xs, *ws, shift)


@functools.partial(jax.jit, static_argnames=("B", "H", "W", "act"))
def pool_pointwise(x, w, shift, *, B, H, W, act):
    """2x2 maxpool fused into the following 1x1 conv.  x: (B*H*W, C) pre-pool;
    returns (B*(H//2)*(W//2), Cout) bf16.  Requires W % 16 == 0."""
    C = x.shape[1]
    cout = w.shape[1]
    P = B * H // 2
    Wh = W // 2
    xv = x.reshape(P, W, 2 * C)              # free contiguous re-view
    rb = _largest_divisor_leq(P, max(1, 1024 // Wh))
    n_out = rb * Wh
    grid = (P // rb,)

    kernel = functools.partial(_pool_pointwise_kernel, W=W, act=act)
    return pl.pallas_call(
        kernel,
        out_shape=jax.ShapeDtypeStruct((B * (H // 2) * Wh, cout), jnp.bfloat16),
        grid=grid,
        in_specs=[pl.BlockSpec((rb, W, 2 * C), lambda i: (i, 0, 0)),
                  pl.BlockSpec((C, cout), lambda i: (0, 0)),
                  pl.BlockSpec((1, cout), lambda i: (0, 0))],
        out_specs=pl.BlockSpec((n_out, cout), lambda i: (i, 0)),
        compiler_params=pltpu.CompilerParams(
            dimension_semantics=("parallel",),
            vmem_limit_bytes=VMEM_LIMIT),
    )(xv, w, shift)


@jax.jit
def attention_gate(g, skip, wg, wx, sg, sx, wpsi, spsi):
    N, C = skip.shape
    F = wg.shape[1]
    n_tile = _pick_tile(N, 1024)
    grid = (N // n_tile,)
    io_spec = pl.BlockSpec((n_tile, C), lambda i: (i, 0))

    def full(shape):
        return pl.BlockSpec(shape, lambda i: (0, 0))

    return pl.pallas_call(
        _attention_kernel,
        out_shape=jax.ShapeDtypeStruct((N, C), jnp.bfloat16),
        grid=grid,
        in_specs=[io_spec, io_spec, full((C, F)), full((C, F)),
                  full((1, F)), full((1, F)), full((1, F)), full((1, 1))],
        out_specs=io_spec,
        compiler_params=pltpu.CompilerParams(
            dimension_semantics=("parallel",),
            vmem_limit_bytes=VMEM_LIMIT),
    )(g, skip, wg, wx, sg, sx, wpsi, spsi)


@functools.partial(jax.jit, static_argnames=("B", "H", "W"))
def maxpool2x2(x2d, *, B, H, W):
    """Fallback pool for tiny spatial widths (W < 16)."""
    C = x2d.shape[1]
    x4 = x2d.reshape(B, H, W, C)
    parts = [x4[:, dy::2, dx::2, :].reshape(-1, C)
             for dy in (0, 1) for dx in (0, 1)]
    N4 = B * (H // 2) * (W // 2)
    n_tile = _pick_tile(N4, 1024)
    grid = (N4 // n_tile,)
    spec = pl.BlockSpec((n_tile, C), lambda i: (i, 0))
    return pl.pallas_call(
        _max4_kernel,
        out_shape=jax.ShapeDtypeStruct((N4, C), x2d.dtype),
        grid=grid,
        in_specs=[spec] * 4,
        out_specs=spec,
        compiler_params=pltpu.CompilerParams(
            dimension_semantics=("parallel",)),
    )(*parts)


@functools.partial(jax.jit, static_argnames=("B", "H", "W"))
def upsample2x(x2d, *, B, H, W):
    """Fallback nearest-2x upsample (XLA glue) for tiny decoder levels."""
    C = x2d.shape[1]
    x4 = x2d.reshape(B, H, W, C)
    u = jnp.repeat(jnp.repeat(x4, 2, axis=1), 2, axis=2)
    return u.reshape(B * 4 * H * W, C)


def _probe_strided_ds():
    """One-shot probe: do strided pl.ds writes on a VMEM ref lower correctly?"""
    def k(x_ref, o_ref, buf_ref):
        buf_ref[pl.ds(0, 8, stride=2), :] = x_ref[0:8, :]
        buf_ref[pl.ds(1, 8, stride=2), :] = x_ref[8:16, :]
        o_ref[...] = buf_ref[...]

    try:
        x = (jnp.arange(16 * 128, dtype=jnp.int32) % 61).astype(jnp.bfloat16)
        x = x.reshape(16, 128)
        y = pl.pallas_call(
            k,
            out_shape=jax.ShapeDtypeStruct((16, 128), jnp.bfloat16),
            scratch_shapes=[pltpu.VMEM((16, 128), jnp.bfloat16)],
        )(x)
        y = jax.block_until_ready(y)
        ref = jnp.zeros((16, 128), jnp.bfloat16)
        ref = ref.at[0::2].set(x[0:8]).at[1::2].set(x[8:16])
        return bool(jnp.array_equal(y, ref))
    except Exception:
        return False


# ----------------------------------------------------------------------------
# Deterministic parameter construction (BN scale folded into weights, bf16)
# ----------------------------------------------------------------------------
class ParamGen:
    def __init__(self, key):
        self.key = key
        self.counter = 0

    def _next(self):
        self.counter += 1
        return jax.random.fold_in(self.key, self.counter)

    @staticmethod
    def _bn_scale(bn):
        return 1.0 / math.sqrt(1.0 + BN_EPS) if bn else 1.0

    def conv3(self, cin, cout, bn=True):
        fan_in = 9 * cin
        w = jax.random.normal(self._next(), (9, cin, cout), jnp.float32)
        w = w * (0.7 / math.sqrt(fan_in))
        bias = jax.random.normal(self._next(), (cout,), jnp.float32) * 0.01
        s = self._bn_scale(bn)
        return {"w": (w * s).reshape(9 * cin, cout).astype(jnp.bfloat16),
                "shift": (bias * s).reshape(1, cout).astype(jnp.float32)}

    def conv1(self, cin, cout, bn=True, split_at=None, pad_to=None):
        w = jax.random.normal(self._next(), (cin, cout), jnp.float32)
        w = w * (0.7 / math.sqrt(cin))
        bias = jax.random.normal(self._next(), (cout,), jnp.float32) * 0.01
        s = self._bn_scale(bn)
        w = w * s
        bias = bias * s
        if pad_to is not None and cout < pad_to:
            w = jnp.pad(w, ((0, 0), (0, pad_to - cout)))
            bias = jnp.pad(bias, (0, pad_to - cout))
        w = w.astype(jnp.bfloat16)
        parts = (w,) if split_at is None else (w[:split_at], w[split_at:])
        return {"w_parts": parts,
                "shift": bias.reshape(1, -1).astype(jnp.float32)}

    def rcnn(self, cin, cout, split_at=None):
        return {"c1": self.conv1(cin, cout, bn=False, split_at=split_at),
                "rec1": self.conv3(cout, cout, bn=True),
                "rec2": self.conv3(cout, cout, bn=True)}

    def attention(self, cout):
        f_int = cout // 2
        g = self.conv1(cout, f_int, bn=True)
        x = self.conv1(cout, f_int, bn=True)
        s = self._bn_scale(True)
        wpsi = jax.random.normal(self._next(), (f_int, 1), jnp.float32)
        wpsi = wpsi * (0.7 / math.sqrt(f_int))
        bpsi = jax.random.normal(self._next(), (1,), jnp.float32) * 0.01
        return {"wg": g["w_parts"][0], "sg": g["shift"],
                "wx": x["w_parts"][0], "sx": x["shift"],
                "wpsi": (wpsi * s).reshape(1, f_int).astype(jnp.float32),
                "spsi": (bpsi * s).reshape(1, 1).astype(jnp.float32)}

    def up(self, cin, cout):
        return {"up_conv": self.conv3(cin, cout, bn=True),
                "att": self.attention(cout),
                "rcnn": self.rcnn(cin, cout, split_at=cout)}


def make_attr2unet_params(key, in_channels, out_classes):
    gen = ParamGen(key)
    ch = CHANNELS
    pad_to = ((out_classes + 127) // 128) * 128
    return {
        "down1": gen.rcnn(in_channels, ch[0]),
        "down2": gen.rcnn(ch[0], ch[1]),
        "down3": gen.rcnn(ch[1], ch[2]),
        "down4": gen.rcnn(ch[2], ch[3]),
        "down5": gen.rcnn(ch[3], ch[4]),
        "up5": gen.up(ch[4], ch[3]),
        "up4": gen.up(ch[3], ch[2]),
        "up3": gen.up(ch[2], ch[1]),
        "up2": gen.up(ch[1], ch[0]),
        "out": gen.conv1(ch[0], out_classes, bn=False, pad_to=pad_to),
        "out_classes": out_classes,
    }


# ----------------------------------------------------------------------------
# Forward pass (activations kept as flat (N, C) bf16)
# ----------------------------------------------------------------------------
def recurrent_forward(x, p, H, W, final_res=None, t=2):
    x1 = conv3x3(x, None, p["w"], p["shift"], None, H=H, W=W, act="relu")
    for step in range(t):
        res = final_res if step == t - 1 else None     # RCNN residual fused
        x1 = conv3x3(x, x1, p["w"], p["shift"], res, H=H, W=W, act="relu")
    return x1


def rcnn_block(x_parts, p, B, H, W, pool_input=False):
    """RCNNBlock: 1x1 conv (optionally fused with the preceding 2x2 maxpool),
    two recurrent 3x3 blocks, residual add of the 1x1 output (fused)."""
    c1 = p["c1"]
    if pool_input:
        Hin, Win = 2 * H, 2 * W
        if Win % 16 == 0:
            x0 = pool_pointwise(x_parts[0], c1["w_parts"][0], c1["shift"],
                                B=B, H=Hin, W=Win, act=None)
        else:
            xp_ = maxpool2x2(x_parts[0], B=B, H=Hin, W=Win)
            x0 = pointwise((xp_,), c1["w_parts"], c1["shift"],
                           act=None, out_dtype=jnp.bfloat16)
    else:
        x0 = pointwise(x_parts, c1["w_parts"], c1["shift"],
                       act=None, out_dtype=jnp.bfloat16)
    # TODO(synk): dropout_chance = 0.0 -> dropout is identity.
    r = recurrent_forward(x0, p["rec1"], H, W)
    r = recurrent_forward(r, p["rec2"], H, W, final_res=x0)
    return r


def up_block(x_low, low_shape, skip, skip_shape, p):
    B, h, w = low_shape
    H, W = skip_shape[1], skip_shape[2]
    uc = p["up_conv"]
    if _FLAGS["strided"] and W >= 16 and (H * W) % 8 == 0:
        # nearest-2x upsample folded into the up_conv patch staging
        g = conv3x3(x_low, None, uc["w"], uc["shift"], None,
                    H=H, W=W, act="relu", upsample=True)
    else:
        u = upsample2x(x_low, B=B, H=h, W=w)
        g = conv3x3(u, None, uc["w"], uc["shift"], None, H=H, W=W, act="relu")
    a = p["att"]
    att = attention_gate(g, skip, a["wg"], a["wx"], a["sg"], a["sx"],
                         a["wpsi"], a["spsi"])
    # concat([att, g]) is realized as a split-weight 1x1 conv inside the RCNN.
    return rcnn_block((att, g), p["rcnn"], B, H, W)


def att_r2unet_forward(params, x_nchw):
    B, cin, H, W = x_nchw.shape
    x = jnp.transpose(x_nchw, (0, 2, 3, 1)).reshape(B * H * W, cin)
    x = x.astype(jnp.bfloat16)

    shapes = [(B, H, W), (B, H // 2, W // 2), (B, H // 4, W // 4),
              (B, H // 8, W // 8), (B, H // 16, W // 16)]

    x1 = rcnn_block((x,), params["down1"], *shapes[0])
    x2 = rcnn_block((x1,), params["down2"], *shapes[1], pool_input=True)
    x3 = rcnn_block((x2,), params["down3"], *shapes[2], pool_input=True)
    x4 = rcnn_block((x3,), params["down4"], *shapes[3], pool_input=True)
    x5 = rcnn_block((x4,), params["down5"], *shapes[4], pool_input=True)

    d4 = up_block(x5, shapes[4], x4, shapes[3], params["up5"])
    d3 = up_block(d4, shapes[3], x3, shapes[2], params["up4"])
    d2 = up_block(d3, shapes[2], x2, shapes[1], params["up3"])
    d1 = up_block(d2, shapes[1], x1, shapes[0], params["up2"])

    out = pointwise((d1,), params["out"]["w_parts"], params["out"]["shift"],
                    act=None, out_dtype=jnp.bfloat16)   # lane-dense (padded)
    oc = params["out_classes"]
    out = out[:, :oc].astype(jnp.float32).reshape(B, H, W, oc)
    return [jnp.transpose(out, (0, 3, 1, 2))]  # back to NCHW


# ----------------------------------------------------------------------------
if __name__ == "__main__":
    _FLAGS["strided"] = _probe_strided_ds()

    B, C_IN, H, W = 2, 4, 16, 16
    OUT_CLASSES = 3

    key = jax.random.PRNGKey(0)
    params = make_attr2unet_params(key, C_IN, OUT_CLASSES)
    x = jax.random.normal(key, (B, C_IN, H, W), jnp.float32)

    outs = att_r2unet_forward(params, x)
    y = jax.block_until_ready(outs[0])

    assert y.shape == (B, OUT_CLASSES, H, W), y.shape
    assert bool(jnp.all(jnp.isfinite(y)))
    print("KERNEL_OK")
</pallas_src>

<mosaic_0001>
module attributes {stable_mosaic.version = 11 : i64} {
  func.func @k(%arg0: memref<16x128xbf16, #tpu.memory_space<vmem>>, %arg1: memref<16x128xbf16, #tpu.memory_space<vmem>>, %arg2: memref<16x128xbf16, #tpu.memory_space<vmem>>) attributes {dimension_semantics = [], scalar_prefetch = 0 : i64, scratch_operands = 1 : i64, tpu.core_type = #tpu.core_type<tc>} {
    %c0 = arith.constant 0 : index
    %c0_0 = arith.constant 0 : index
    %0 = vector.load %arg0[%c0, %c0_0] : memref<16x128xbf16, #tpu.memory_space<vmem>>, vector<8x128xbf16>
    %c0_1 = arith.constant 0 : index
    %c0_2 = arith.constant 0 : index
    %1 = tpu.strided_load %arg2[%c0_1, %c0_2] {strides = array<i32: 2, 1>} : memref<16x128xbf16, #tpu.memory_space<vmem>>, vector<8x128xbf16>
    tpu.strided_store %arg2[%c0_1, %c0_2], %0 {strides = array<i32: 2, 1>} : memref<16x128xbf16, #tpu.memory_space<vmem>>, vector<8x128xbf16>
    %c8 = arith.constant 8 : index
    %c0_3 = arith.constant 0 : index
    %2 = vector.load %arg0[%c8, %c0_3] : memref<16x128xbf16, #tpu.memory_space<vmem>>, vector<8x128xbf16>
    %c1 = arith.constant 1 : index
    %c0_4 = arith.constant 0 : index
    %3 = tpu.strided_load %arg2[%c1, %c0_4] {strides = array<i32: 2, 1>} : memref<16x128xbf16, #tpu.memory_space<vmem>>, vector<8x128xbf16>
    tpu.strided_store %arg2[%c1, %c0_4], %2 {strides = array<i32: 2, 1>} : memref<16x128xbf16, #tpu.memory_space<vmem>>, vector<8x128xbf16>
    %c0_5 = arith.constant 0 : index
    %c0_6 = arith.constant 0 : index
    %4 = vector.load %arg2[%c0_5, %c0_6] : memref<16x128xbf16, #tpu.memory_space<vmem>>, vector<16x128xbf16>
    %c0_7 = arith.constant 0 : index
    %c0_8 = arith.constant 0 : index
    %5 = vector.load %arg1[%c0_7, %c0_8] : memref<16x128xbf16, #tpu.memory_space<vmem>>, vector<16x128xbf16>
    tpu.vector_store %arg1[%c0_7, %c0_8], %4 {strides = array<i32>} : memref<16x128xbf16, #tpu.memory_space<vmem>>, vector<16x128xbf16>,
    return
  }
}

module attributes {stable_mosaic.version = 11 : i64} {
  func.func @_pointwise_kernel(%arg0: i32, %arg1: memref<512x4xbf16, #tpu.memory_space<vmem>>, %arg2: memref<4x64xbf16, #tpu.memory_space<vmem>>, %arg3: memref<1x64xf32, #tpu.memory_space<vmem>>, %arg4: memref<512x64xbf16, #tpu.memory_space<vmem>>) attributes {dimension_semantics = [#tpu.dimension_semantics<parallel>], iteration_bounds = array<i64: 1>, scalar_prefetch = 0 : i64, scratch_operands = 0 : i64, tpu.core_type = #tpu.core_type<tc>, window_params = [{transform_indices = @transform_0, window_bounds = array<i64: 512, 4>}, {pipeline_mode = #tpu.pipeline_mode<synchronous>, transform_indices = @transform_1, window_bounds = array<i64: 4, 64>}, {pipeline_mode = #tpu.pipeline_mode<synchronous>, transform_indices = @transform_2, window_bounds = array<i64: 1, 64>}, {transform_indices = @transform_3, window_bounds = array<i64: 512, 64>}]} {
    %c0 = arith.constant 0 : index
    %c0_0 = arith.constant 0 : index
    %0 = vector.load %arg1[%c0, %c0_0] : memref<512x4xbf16, #tpu.memory_space<vmem>>, vector<512x4xbf16>
    %c0_1 = arith.constant 0 : index
    %c0_2 = arith.constant 0 : index
    %1 = vector.load %arg2[%c0_1, %c0_2] : memref<4x64xbf16, #tpu.memory_space<vmem>>, vector<4x64xbf16>
    %cst = arith.constant dense<0.000000e+00> : vector<512x64xf32>
    %2 = tpu.matmul %0, %1, %cst {dimension_numbers = #tpu.dot_dimension_numbers<[1], [0], [0], [1], [0, 0, 1, 1], [], []>} : vector<512x4xbf16>, vector<4x64xbf16>, vector<512x64xf32> -> vector<512x64xf32>
    %c0_3 = arith.constant 0 : index
    %c0_4 = arith.constant 0 : index
    %3 = vector.load %arg3[%c0_3, %c0_4] : memref<1x64xf32, #tpu.memory_space<vmem>>, vector<1x64xf32>
    %4 = vector.broadcast %3 : vector<1x64xf32> to vector<512x64xf32>
    %5 = arith.addf %2, %4 : vector<512x64xf32>
    %6 = arith.truncf %5 : vector<512x64xf32> to vector<512x64xbf16>
    %c0_5 = arith.constant 0 : index
    %c0_6 = arith.constant 0 : index
    %7 = vector.load %arg4[%c0_5, %c0_6] : memref<512x64xbf16, #tpu.memory_space<vmem>>, vector<512x64xbf16>
    tpu.vector_store %arg4[%c0_5, %c0_6], %6 {strides = array<i32>} : memref<512x64xbf16, #tpu.memory_space<vmem>>, vector<512x64xbf16>,
    return
  }
  func.func @transform_0(%arg0: i32) -> (i32, i32) {
    %c0_i32 = arith.constant 0 : i32
    %c0_i32_0 = arith.constant 0 : i32
    return %arg0, %c0_i32 : i32, i32
  }
  func.func @transform_1(%arg0: i32) -> (i32, i32) {
    %c0_i32 = arith.constant 0 : i32
    %c0_i32_0 = arith.constant 0 : i32
    %c0_i32_1 = arith.constant 0 : i32
    return %c0_i32, %c0_i32_0 : i32, i32
  }
  func.func @transform_2(%arg0: i32) -> (i32, i32) {
    %c0_i32 = arith.constant 0 : i32
    %c0_i32_0 = arith.constant 0 : i32
    %c0_i32_1 = arith.constant 0 : i32
    return %c0_i32, %c0_i32_0 : i32, i32
  }
  func.func @transform_3(%arg0: i32) -> (i32, i32) {
    %c0_i32 = arith.constant 0 : i32
    %c0_i32_0 = arith.constant 0 : i32
    return %arg0, %c0_i32 : i32, i32
  }
}

</mosaic_0001>

<bundles_post_ra>
// kernel: pointwise.1
= control target key start
LH: loop header
LB: loop body
LE: loop exit
PB: predicated region body
PF: predicated region fallthrough
CT: control target
= control target key end

     0   :  { %vm344_vm0 = vcmask 1041408   ;;  %vm247_vm1 = vcmask 31744   ;;  %vm893_vm2 = vcmask 519168   ;;  %s1766_s1 = inlined_call_operand.vmem [shape: bf16[4,64], index: 1, kind: input, shape index: {}]   ;;  %s1767_s0 = inlined_call_operand.vmem [shape: bf16[512,4], index: 0, kind: input, shape index: {}]   ;;  %s1768_s2 = inlined_call_operand.vmem [shape: f32[1,64], index: 2, kind: input, shape index: {}]   ;;  %s1769_s3 = inlined_call_operand.vmem [shape: bf16[512,64], index: 3, kind: output, shape index: {}]  }
   0x1   :  { %v79_v0 = vld [vmem:[%s1766_s1] sm:$0x3]  ;;  %v1260_v4 = vld [vmem:[%s1767_s0 + $0x8] sm:$0xff]   ;;  %v1262_v6 = vld [vmem:[%s1767_s0 + $0x10] sm:$0xff]  }
   0x2   :  { %1256 = vmatprep.subr.msk.bf16.mxu0 %vm344_vm0, %v79_v0  ;;  %1257 = vmatprep.subr.msk.bf16.mxu1 %vm344_vm0, %v79_v0  ;;  %v346_v1 = vsel %vm344_vm0, %v79_v0, 0  ;;  %v1258_v2 = vld [vmem:[%s1767_s0] sm:$0xff]   ;;  %v1261_v5 = vld [vmem:[%s1767_s0 + $0x88] sm:$0xff]   ;;  %v1263_v7 = vld [vmem:[%s1767_s0 + $0x90] sm:$0xff]  }
   0x3   :  { %1189 = vmatpush3.bf16.msra.mxu0 %v346_v1  ;;  %1255 = vmatpush3.bf16.msra.mxu1 %v346_v1  ;;  %v1259_v3 = vld [vmem:[%s1767_s0 + $0x80] sm:$0xff]   ;;  %v1264_v8 = vld [vmem:[%s1767_s0 + $0x18] sm:$0xff]   ;;  %v1268_v12 = vld [vmem:[%s1767_s0 + $0x28] sm:$0xff]  }
   0x4   :  { %1190 = vmatprep.mubr.msk.bf16.mxu0 %vm247_vm1, %v1258_v2  ;;  %1222 = vmatprep.mubr.msk.bf16.mxu1 %vm247_vm1, %v1259_v3  ;;  %v1265_v9 = vld [vmem:[%s1767_s0 + $0x98] sm:$0xff]   ;;  %v1266_v10 = vld [vmem:[%s1767_s0 + $0x20] sm:$0xff]   ;;  %v1269_v13 = vld [vmem:[%s1767_s0 + $0xa8] sm:$0xff]  }
   0x5   :  { %v1267_v11 = vld [vmem:[%s1767_s0 + $0xa0] sm:$0xff]   ;;  %v1270_v14 = vld [vmem:[%s1767_s0 + $0x30] sm:$0xff]   ;;  %v1272_v16 = vld [vmem:[%s1767_s0 + $0x38] sm:$0xff]  }
   0x6   :  { %1191 = vmatmul.mubr.msk.bf16.vlgmr.msra.gmra.mrb[0].mxu0 %vm247_vm1, %v1260_v4  ;;  %1223 = vmatmul.mubr.msk.bf16.vlgmr.msra.gmra.mrb[0].mxu1 %vm247_vm1, %v1261_v5  ;;  %v1271_v15 = vld [vmem:[%s1767_s0 + $0xb0] sm:$0xff]   ;;  %v1273_v17 = vld [vmem:[%s1767_s0 + $0xb8] sm:$0xff]   ;;  %v1274_v18 = vld [vmem:[%s1767_s0 + $0x40] sm:$0xff]  }
   0x7   :  { %1194 = vmatprep.mubr.msk.bf16.mxu0 %vm247_vm1, %v1262_v6  ;;  %1226 = vmatprep.mubr.msk.bf16.mxu1 %vm247_vm1, %v1263_v7  ;;  %v1275_v19 = vld [vmem:[%s1767_s0 + $0xc0] sm:$0xff]   ;;  %v1276_v20 = vld [vmem:[%s1767_s0 + $0x48] sm:$0xff]   ;;  %v1278_v22 = vld [vmem:[%s1767_s0 + $0x50] sm:$0xff]  }
   0x8   :  { %v1277_v21 = vld [vmem:[%s1767_s0 + $0xc8] sm:$0xff]   ;;  %v1279_v23 = vld [vmem:[%s1767_s0 + $0xd0] sm:$0xff]   ;;  %v1280_v24 = vld [vmem:[%s1767_s0 + $0x58] sm:$0xff]  }
   0x9   :  { %v1281_v25 = vld [vmem:[%s1767_s0 + $0xd8] sm:$0xff]   ;;  %v1282_v26 = vld [vmem:[%s1767_s0 + $0x60] sm:$0xff]   ;;  %v1284_v28 = vld [vmem:[%s1767_s0 + $0x68] sm:$0xff]  }
   0xa   :  { %v1283_v27 = vld [vmem:[%s1767_s0 + $0xe0] sm:$0xff]   ;;  %v1285_v29 = vld [vmem:[%s1767_s0 + $0xe8] sm:$0xff]   ;;  %v1286_v30 = vld [vmem:[%s1767_s0 + $0x70] sm:$0xff]  }
   0xb   :  { %v1287_v31 = vld [vmem:[%s1767_s0 + $0xf0] sm:$0xff]   ;;  %v1288_v32 = vld [vmem:[%s1767_s0 + $0x78] sm:$0xff]   ;;  %v1444_v34 = vld [vmem:[%s1768_s2] ss:$0 sm:$0xff] }
   0xc   :  { %v1289_v33 = vld [vmem:[%s1767_s0 + $0xf8] sm:$0xff]  }
   0xe   :  { %1195 = vmatmul.mubr.msk.bf16.gmra.mrb[4].mxu0 %vm247_vm1, %v1264_v8  ;;  %1227 = vmatmul.mubr.msk.bf16.gmra.mrb[4].mxu1 %vm247_vm1, %v1265_v9 }
   0xf   :  { %1198 = vmatprep.mubr.msk.bf16.mxu0 %vm247_vm1, %v1266_v10  ;;  %1230 = vmatprep.mubr.msk.bf16.mxu1 %vm247_vm1, %v1267_v11 }
  0x16   :  { %1199 = vmatmul.mubr.msk.bf16.gmra.mrb[8].mxu0 %vm247_vm1, %v1268_v12  ;;  %1231 = vmatmul.mubr.msk.bf16.gmra.mrb[8].mxu1 %vm247_vm1, %v1269_v13 }
  0x17   :  { %1202 = vmatprep.mubr.msk.bf16.mxu0 %vm247_vm1, %v1270_v14  ;;  %1234 = vmatprep.mubr.msk.bf16.mxu1 %vm247_vm1, %v1271_v15 }
  0x1e   :  { %1203 = vmatmul.mubr.msk.bf16.gmra.mrb[12].mxu0 %vm247_vm1, %v1272_v16  ;;  %1235 = vmatmul.mubr.msk.bf16.gmra.mrb[12].mxu1 %vm247_vm1, %v1273_v17 }
  0x1f   :  { %1206 = vmatprep.mubr.msk.bf16.mxu0 %vm247_vm1, %v1274_v18  ;;  %1238 = vmatprep.mubr.msk.bf16.mxu1 %vm247_vm1, %v1275_v19 }
  0x26   :  { %1207 = vmatmul.mubr.msk.bf16.gmra.mrb[16].mxu0 %vm247_vm1, %v1276_v20  ;;  %1239 = vmatmul.mubr.msk.bf16.gmra.mrb[16].mxu1 %vm247_vm1, %v1277_v21 }
  0x27   :  { %1210 = vmatprep.mubr.msk.bf16.mxu0 %vm247_vm1, %v1278_v22  ;;  %1242 = vmatprep.mubr.msk.bf16.mxu1 %vm247_vm1, %v1279_v23 }
  0x2e   :  { %1211 = vmatmul.mubr.msk.bf16.gmra.mrb[20].mxu0 %vm247_vm1, %v1280_v24  ;;  %1243 = vmatmul.mubr.msk.bf16.gmra.mrb[20].mxu1 %vm247_vm1, %v1281_v25 }
  0x2f   :  { %1214 = vmatprep.mubr.msk.bf16.mxu0 %vm247_vm1, %v1282_v26  ;;  %1246 = vmatprep.mubr.msk.bf16.mxu1 %vm247_vm1, %v1283_v27 }
  0x36   :  { %1215 = vmatmul.mubr.msk.bf16.gmra.mrb[24].mxu0 %vm247_vm1, %v1284_v28  ;;  %1247 = vmatmul.mubr.msk.bf16.gmra.mrb[24].mxu1 %vm247_vm1, %v1285_v29 }
  0x37   :  { %1218 = vmatprep.mubr.msk.bf16.mxu0 %vm247_vm1, %v1286_v30  ;;  %1250 = vmatprep.mubr.msk.bf16.mxu1 %vm247_vm1, %v1287_v31 }
  0x3e   :  { %1219 = vmatmul.mubr.msk.bf16.gmra.mrb[28].mxu0 %vm247_vm1, %v1288_v32  ;;  %1251 = vmatmul.mubr.msk.bf16.gmra.mrb[28].mxu1 %vm247_vm1, %v1289_v33 }
  0xd9   :  { %v1192_v35 = vpop.f32.mrb[0].mxu0  ;;  %v1224_v37 = vpop.f32.mrb[0].mxu1 }
  0xda   :  { %v391_v36 = vadd.f32 %v1192_v35, %v1444_v34  ;;  %v382_v38 = vpop.f32.mrb[1].mxu0  ;;  %v519_v39 = vadd.f32 %v1224_v37, %v1444_v34  ;;  %v510_v41 = vpop.f32.mrb[1].mxu1 }
  0xdb   :  { %v383_v40 = vadd.f32 %v1444_v34, %v382_v38  ;;  %v1193_v42 = vpop.f32.mrb[2].mxu0  ;;  %v511_v44 = vadd.f32 %v1444_v34, %v510_v41  ;;  %v1225_v46 = vpop.f32.mrb[2].mxu1 }
  0xdc   :  { %v1093_v43 = vpack.c.bf16 %v391_v36, %v391_v36  ;;  %v394_v45 = vadd.f32 %v1193_v42, %v1444_v34  ;;  %v385_v47 = vpop.f32.mrb[3].mxu0  ;;  %v1125_v48 = vpack.c.bf16 %v519_v39, %v519_v39  ;;  %v522_v50 = vadd.f32 %v1225_v46, %v1444_v34  ;;  %v513_v52 = vpop.f32.mrb[3].mxu1 }
  0xdd   :  { %v1091_v49 = vpack.c.bf16 %v383_v40, %v383_v40  ;;  %v386_v51 = vadd.f32 %v1444_v34, %v385_v47  ;;  %v1123_v53 = vpack.c.bf16 %v511_v44, %v511_v44  ;;  %v514_v55 = vadd.f32 %v1444_v34, %v513_v52 }
  0xde   :  { %896 = vst.msk [vmem:[%s1769_s3 + $0x8] sm:$0xf] %vm893_vm2, %v1093_v43  ;;  %v1094_v54 = vpack.c.bf16 %v394_v45, %v394_v45  ;;  %928 = vst.msk [vmem:[%s1769_s3 + $0x88] sm:$0xf] %vm893_vm2, %v1125_v48  ;;  %v1126_v56 = vpack.c.bf16 %v522_v50, %v522_v50 }
  0xdf   :  { %894 = vst.msk [vmem:[%s1769_s3] sm:$0xf] %vm893_vm2, %v1091_v49  ;;  %v1092_v57 = vpack.c.bf16 %v386_v51, %v386_v51  ;;  %926 = vst.msk [vmem:[%s1769_s3 + $0x80] sm:$0xf] %vm893_vm2, %v1123_v53  ;;  %v1124_v58 = vpack.c.bf16 %v514_v55, %v514_v55 }
  0xe0   :  { %897 = vst.msk [vmem:[%s1769_s3 + $0xc] sm:$0xf] %vm893_vm2, %v1094_v54  ;;  %929 = vst.msk [vmem:[%s1769_s3 + $0x8c] sm:$0xf] %vm893_vm2, %v1126_v56 }
  0xe1   :  { %895 = vst.msk [vmem:[%s1769_s3 + $0x4] sm:$0xf] %vm893_vm2, %v1092_v57  ;;  %v1196_v59 = vpop.f32.mrb[4].mxu0  ;;  %927 = vst.msk [vmem:[%s1769_s3 + $0x84] sm:$0xf] %vm893_vm2, %v1124_v58  ;;  %v1228_v61 = vpop.f32.mrb[4].mxu1 }
  0xe2   :  { %v407_v60 = vadd.f32 %v1196_v59, %v1444_v34  ;;  %v398_v62 = vpop.f32.mrb[5].mxu0  ;;  %v535_v63 = vadd.f32 %v1228_v61, %v1444_v34  ;;  %v526_v1 = vpop.f32.mrb[5].mxu1 }
  0xe3   :  { %v399_v0 = vadd.f32 %v1444_v34, %v398_v62  ;;  %v1197_v2 = vpop.f32.mrb[6].mxu0  ;;  %v527_v4 = vadd.f32 %v1444_v34, %v526_v1  ;;  %v1229_v6 = vpop.f32.mrb[6].mxu1 }
  0xe4   :  { %v1097_v3 = vpack.c.bf16 %v407_v60, %v407_v60  ;;  %v410_v5 = vadd.f32 %v1197_v2, %v1444_v34  ;;  %v401_v7 = vpop.f32.mrb[7].mxu0  ;;  %v1129_v8 = vpack.c.bf16 %v535_v63, %v535_v63  ;;  %v538_v10 = vadd.f32 %v1229_v6, %v1444_v34  ;;  %v529_v12 = vpop.f32.mrb[7].mxu1 }
  0xe5   :  { %v1095_v9 = vpack.c.bf16 %v399_v0, %v399_v0  ;;  %v402_v11 = vadd.f32 %v1444_v34, %v401_v7  ;;  %v1127_v13 = vpack.c.bf16 %v527_v4, %v527_v4  ;;  %v530_v15 = vadd.f32 %v1444_v34, %v529_v12 }
  0xe6   :  { %900 = vst.msk [vmem:[%s1769_s3 + $0x18] sm:$0xf] %vm893_vm2, %v1097_v3  ;;  %v1098_v14 = vpack.c.bf16 %v410_v5, %v410_v5  ;;  %932 = vst.msk [vmem:[%s1769_s3 + $0x98] sm:$0xf] %vm893_vm2, %v1129_v8  ;;  %v1130_v16 = vpack.c.bf16 %v538_v10, %v538_v10 }
  0xe7   :  { %898 = vst.msk [vmem:[%s1769_s3 + $0x10] sm:$0xf] %vm893_vm2, %v1095_v9  ;;  %v1096_v17 = vpack.c.bf16 %v402_v11, %v402_v11  ;;  %930 = vst.msk [vmem:[%s1769_s3 + $0x90] sm:$0xf] %vm893_vm2, %v1127_v13  ;;  %v1128_v18 = vpack.c.bf16 %v530_v15, %v530_v15 }
  0xe8   :  { %901 = vst.msk [vmem:[%s1769_s3 + $0x1c] sm:$0xf] %vm893_vm2, %v1098_v14  ;;  %933 = vst.msk [vmem:[%s1769_s3 + $0x9c] sm:$0xf] %vm893_vm2, %v1130_v16 }
  0xe9   :  { %899 = vst.msk [vmem:[%s1769_s3 + $0x14] sm:$0xf] %vm893_vm2, %v1096_v17  ;;  %v1200_v19 = vpop.f32.mrb[8].mxu0  ;;  %931 = vst.msk [vmem:[%s1769_s3 + $0x94] sm:$0xf] %vm893_vm2, %v1128_v18  ;;  %v1232_v21 = vpop.f32.mrb[8].mxu1 }
  0xea   :  { %v423_v20 = vadd.f32 %v1200_v19, %v1444_v34  ;;  %v414_v22 = vpop.f32.mrb[9].mxu0  ;;  %v551_v23 = vadd.f32 %v1232_v21, %v1444_v34  ;;  %v542_v25 = vpop.f32.mrb[9].mxu1 }
  0xeb   :  { %v415_v24 = vadd.f32 %v1444_v34, %v414_v22  ;;  %v1201_v26 = vpop.f32.mrb[10].mxu0  ;;  %v543_v28 = vadd.f32 %v1444_v34, %v542_v25  ;;  %v1233_v30 = vpop.f32.mrb[10].mxu1 }
  0xec   :  { %v1101_v27 = vpack.c.bf16 %v423_v20, %v423_v20  ;;  %v426_v29 = vadd.f32 %v1201_v26, %v1444_v34  ;;  %v417_v31 = vpop.f32.mrb[11].mxu0  ;;  %v1133_v32 = vpack.c.bf16 %v551_v23, %v551_v23  ;;  %v554_v35 = vadd.f32 %v1233_v30, %v1444_v34  ;;  %v545_v37 = vpop.f32.mrb[11].mxu1 }
  0xed   :  { %v1099_v33 = vpack.c.bf16 %v415_v24, %v415_v24  ;;  %v418_v36 = vadd.f32 %v1444_v34, %v417_v31  ;;  %v1131_v38 = vpack.c.bf16 %v543_v28, %v543_v28  ;;  %v546_v40 = vadd.f32 %v1444_v34, %v545_v37 }
  0xee   :  { %904 = vst.msk [vmem:[%s1769_s3 + $0x28] sm:$0xf] %vm893_vm2, %v1101_v27  ;;  %v1102_v39 = vpack.c.bf16 %v426_v29, %v426_v29  ;;  %936 = vst.msk [vmem:[%s1769_s3 + $0xa8] sm:$0xf] %vm893_vm2, %v1133_v32  ;;  %v1134_v41 = vpack.c.bf16 %v554_v35, %v554_v35 }
  0xef   :  { %902 = vst.msk [vmem:[%s1769_s3 + $0x20] sm:$0xf] %vm893_vm2, %v1099_v33  ;;  %v1100_v42 = vpack.c.bf16 %v418_v36, %v418_v36  ;;  %934 = vst.msk [vmem:[%s1769_s3 + $0xa0] sm:$0xf] %vm893_vm2, %v1131_v38  ;;  %v1132_v43 = vpack.c.bf16 %v546_v40, %v546_v40 }
  0xf0   :  { %905 = vst.msk [vmem:[%s1769_s3 + $0x2c] sm:$0xf] %vm893_vm2, %v1102_v39  ;;  %937 = vst.msk [vmem:[%s1769_s3 + $0xac] sm:$0xf] %vm893_vm2, %v1134_v41 }
  0xf1   :  { %903 = vst.msk [vmem:[%s1769_s3 + $0x24] sm:$0xf] %vm893_vm2, %v1100_v42  ;;  %v1204_v44 = vpop.f32.mrb[12].mxu0  ;;  %935 = vst.msk [vmem:[%s1769_s3 + $0xa4] sm:$0xf] %vm893_vm2, %v1132_v43  ;;  %v1236_v46 = vpop.f32.mrb[12].mxu1 }
  0xf2   :  { %v439_v45 = vadd.f32 %v1204_v44, %v1444_v34  ;;  %v430_v47 = vpop.f32.mrb[13].mxu0  ;;  %v567_v48 = vadd.f32 %v1236_v46, %v1444_v34  ;;  %v558_v50 = vpop.f32.mrb[13].mxu1 }
  0xf3   :  { %v431_v49 = vadd.f32 %v1444_v34, %v430_v47  ;;  %v1205_v51 = vpop.f32.mrb[14].mxu0  ;;  %v559_v53 = vadd.f32 %v1444_v34, %v558_v50  ;;  %v1237_v55 = vpop.f32.mrb[14].mxu1 }
  0xf4   :  { %v1105_v52 = vpack.c.bf16 %v439_v45, %v439_v45  ;;  %v442_v54 = vadd.f32 %v1205_v51, %v1444_v34  ;;  %v433_v56 = vpop.f32.mrb[15].mxu0  ;;  %v1137_v57 = vpack.c.bf16 %v567_v48, %v567_v48  ;;  %v570_v59 = vadd.f32 %v1237_v55, %v1444_v34  ;;  %v561_v61 = vpop.f32.mrb[15].mxu1 }
  0xf5   :  { %v1103_v58 = vpack.c.bf16 %v431_v49, %v431_v49  ;;  %v434_v60 = vadd.f32 %v1444_v34, %v433_v56  ;;  %v1135_v62 = vpack.c.bf16 %v559_v53, %v559_v53  ;;  %v562_v0 = vadd.f32 %v1444_v34, %v561_v61 }
  0xf6   :  { %908 = vst.msk [vmem:[%s1769_s3 + $0x38] sm:$0xf] %vm893_vm2, %v1105_v52  ;;  %v1106_v63 = vpack.c.bf16 %v442_v54, %v442_v54  ;;  %940 = vst.msk [vmem:[%s1769_s3 + $0xb8] sm:$0xf] %vm893_vm2, %v1137_v57  ;;  %v1138_v1 = vpack.c.bf16 %v570_v59, %v570_v59 }
  0xf7   :  { %906 = vst.msk [vmem:[%s1769_s3 + $0x30] sm:$0xf] %vm893_vm2, %v1103_v58  ;;  %v1104_v2 = vpack.c.bf16 %v434_v60, %v434_v60  ;;  %938 = vst.msk [vmem:[%s1769_s3 + $0xb0] sm:$0xf] %vm893_vm2, %v1135_v62  ;;  %v1136_v3 = vpack.c.bf16 %v562_v0, %v562_v0 }
  0xf8   :  { %909 = vst.msk [vmem:[%s1769_s3 + $0x3c] sm:$0xf] %vm893_vm2, %v1106_v63  ;;  %941 = vst.msk [vmem:[%s1769_s3 + $0xbc] sm:$0xf] %vm893_vm2, %v1138_v1 }
  0xf9   :  { %907 = vst.msk [vmem:[%s1769_s3 + $0x34] sm:$0xf] %vm893_vm2, %v1104_v2  ;;  %v1208_v4 = vpop.f32.mrb[16].mxu0  ;;  %939 = vst.msk [vmem:[%s1769_s3 + $0xb4] sm:$0xf] %vm893_vm2, %v1136_v3  ;;  %v1240_v6 = vpop.f32.mrb[16].mxu1 }
  0xfa   :  { %v455_v5 = vadd.f32 %v1208_v4, %v1444_v34  ;;  %v446_v7 = vpop.f32.mrb[17].mxu0  ;;  %v583_v8 = vadd.f32 %v1240_v6, %v1444_v34  ;;  %v574_v10 = vpop.f32.mrb[17].mxu1 }
  0xfb   :  { %v447_v9 = vadd.f32 %v1444_v34, %v446_v7  ;;  %v1209_v11 = vpop.f32.mrb[18].mxu0  ;;  %v575_v13 = vadd.f32 %v1444_v34, %v574_v10  ;;  %v1241_v15 = vpop.f32.mrb[18].mxu1 }
  0xfc   :  { %v1109_v12 = vpack.c.bf16 %v455_v5, %v455_v5  ;;  %v458_v14 = vadd.f32 %v1209_v11, %v1444_v34  ;;  %v449_v16 = vpop.f32.mrb[19].mxu0  ;;  %v1141_v17 = vpack.c.bf16 %v583_v8, %v583_v8  ;;  %v586_v19 = vadd.f32 %v1241_v15, %v1444_v34  ;;  %v577_v21 = vpop.f32.mrb[19].mxu1 }
  0xfd   :  { %v1107_v18 = vpack.c.bf16 %v447_v9, %v447_v9  ;;  %v450_v20 = vadd.f32 %v1444_v34, %v449_v16  ;;  %v1139_v22 = vpack.c.bf16 %v575_v13, %v575_v13  ;;  %v578_v24 = vadd.f32 %v1444_v34, %v577_v21 }
  0xfe   :  { %912 = vst.msk [vmem:[%s1769_s3 + $0x48] sm:$0xf] %vm893_vm2, %v1109_v12  ;;  %v1110_v23 = vpack.c.bf16 %v458_v14, %v458_v14  ;;  %944 = vst.msk [vmem:[%s1769_s3 + $0xc8] sm:$0xf] %vm893_vm2, %v1141_v17  ;;  %v1142_v25 = vpack.c.bf16 %v586_v19, %v586_v19 }
  0xff   :  { %910 = vst.msk [vmem:[%s1769_s3 + $0x40] sm:$0xf] %vm893_vm2, %v1107_v18  ;;  %v1108_v26 = vpack.c.bf16 %v450_v20, %v450_v20  ;;  %942 = vst.msk [vmem:[%s1769_s3 + $0xc0] sm:$0xf] %vm893_vm2, %v1139_v22  ;;  %v1140_v27 = vpack.c.bf16 %v578_v24, %v578_v24 }
 0x100   :  { %913 = vst.msk [vmem:[%s1769_s3 + $0x4c] sm:$0xf] %vm893_vm2, %v1110_v23  ;;  %945 = vst.msk [vmem:[%s1769_s3 + $0xcc] sm:$0xf] %vm893_vm2, %v1142_v25 }
 0x101   :  { %911 = vst.msk [vmem:[%s1769_s3 + $0x44] sm:$0xf] %vm893_vm2, %v1108_v26  ;;  %v1212_v28 = vpop.f32.mrb[20].mxu0  ;;  %943 = vst.msk [vmem:[%s1769_s3 + $0xc4] sm:$0xf] %vm893_vm2, %v1140_v27  ;;  %v1244_v30 = vpop.f32.mrb[20].mxu1 }
 0x102   :  { %v471_v29 = vadd.f32 %v1212_v28, %v1444_v34  ;;  %v462_v31 = vpop.f32.mrb[21].mxu0  ;;  %v599_v32 = vadd.f32 %v1244_v30, %v1444_v34  ;;  %v590_v35 = vpop.f32.mrb[21].mxu1 }
 0x103   :  { %v463_v33 = vadd.f32 %v1444_v34, %v462_v31  ;;  %v1213_v36 = vpop.f32.mrb[22].mxu0  ;;  %v591_v38 = vadd.f32 %v1444_v34, %v590_v35  ;;  %v1245_v40 = vpop.f32.mrb[22].mxu1 }
 0x104   :  { %v1113_v37 = vpack.c.bf16 %v471_v29, %v471_v29  ;;  %v474_v39 = vadd.f32 %v1213_v36, %v1444_v34  ;;  %v465_v41 = vpop.f32.mrb[23].mxu0  ;;  %v1145_v42 = vpack.c.bf16 %v599_v32, %v599_v32  ;;  %v602_v44 = vadd.f32 %v1245_v40, %v1444_v34  ;;  %v593_v46 = vpop.f32.mrb[23].mxu1 }
 0x105   :  { %v1111_v43 = vpack.c.bf16 %v463_v33, %v463_v33  ;;  %v466_v45 = vadd.f32 %v1444_v34, %v465_v41  ;;  %v1143_v47 = vpack.c.bf16 %v591_v38, %v591_v38  ;;  %v594_v49 = vadd.f32 %v1444_v34, %v593_v46 }
 0x106   :  { %916 = vst.msk [vmem:[%s1769_s3 + $0x58] sm:$0xf] %vm893_vm2, %v1113_v37  ;;  %v1114_v48 = vpack.c.bf16 %v474_v39, %v474_v39  ;;  %948 = vst.msk [vmem:[%s1769_s3 + $0xd8] sm:$0xf] %vm893_vm2, %v1145_v42  ;;  %v1146_v50 = vpack.c.bf16 %v602_v44, %v602_v44 }
 0x107   :  { %914 = vst.msk [vmem:[%s1769_s3 + $0x50] sm:$0xf] %vm893_vm2, %v1111_v43  ;;  %v1112_v51 = vpack.c.bf16 %v466_v45, %v466_v45  ;;  %946 = vst.msk [vmem:[%s1769_s3 + $0xd0] sm:$0xf] %vm893_vm2, %v1143_v47  ;;  %v1144_v52 = vpack.c.bf16 %v594_v49, %v594_v49 }
 0x108   :  { %917 = vst.msk [vmem:[%s1769_s3 + $0x5c] sm:$0xf] %vm893_vm2, %v1114_v48  ;;  %949 = vst.msk [vmem:[%s1769_s3 + $0xdc] sm:$0xf] %vm893_vm2, %v1146_v50 }
 0x109   :  { %915 = vst.msk [vmem:[%s1769_s3 + $0x54] sm:$0xf] %vm893_vm2, %v1112_v51  ;;  %v1216_v53 = vpop.f32.mrb[24].mxu0  ;;  %947 = vst.msk [vmem:[%s1769_s3 + $0xd4] sm:$0xf] %vm893_vm2, %v1144_v52  ;;  %v1248_v55 = vpop.f32.mrb[24].mxu1 }
 0x10a   :  { %v487_v54 = vadd.f32 %v1216_v53, %v1444_v34  ;;  %v478_v56 = vpop.f32.mrb[25].mxu0  ;;  %v615_v57 = vadd.f32 %v1248_v55, %v1444_v34  ;;  %v606_v59 = vpop.f32.mrb[25].mxu1 }
 0x10b   :  { %v479_v58 = vadd.f32 %v1444_v34, %v478_v56  ;;  %v1217_v60 = vpop.f32.mrb[26].mxu0  ;;  %v607_v62 = vadd.f32 %v1444_v34, %v606_v59  ;;  %v1249_v0 = vpop.f32.mrb[26].mxu1 }
 0x10c   :  { %v1117_v61 = vpack.c.bf16 %v487_v54, %v487_v54  ;;  %v490_v63 = vadd.f32 %v1217_v60, %v1444_v34  ;;  %v481_v1 = vpop.f32.mrb[27].mxu0  ;;  %v1149_v2 = vpack.c.bf16 %v615_v57, %v615_v57  ;;  %v618_v4 = vadd.f32 %v1249_v0, %v1444_v34  ;;  %v609_v6 = vpop.f32.mrb[27].mxu1 }
 0x10d   :  { %v1115_v3 = vpack.c.bf16 %v479_v58, %v479_v58  ;;  %v482_v5 = vadd.f32 %v1444_v34, %v481_v1  ;;  %v1147_v7 = vpack.c.bf16 %v607_v62, %v607_v62  ;;  %v610_v9 = vadd.f32 %v1444_v34, %v609_v6 }
 0x10e   :  { %920 = vst.msk [vmem:[%s1769_s3 + $0x68] sm:$0xf] %vm893_vm2, %v1117_v61  ;;  %v1118_v8 = vpack.c.bf16 %v490_v63, %v490_v63  ;;  %952 = vst.msk [vmem:[%s1769_s3 + $0xe8] sm:$0xf] %vm893_vm2, %v1149_v2  ;;  %v1150_v10 = vpack.c.bf16 %v618_v4, %v618_v4 }
 0x10f   :  { %918 = vst.msk [vmem:[%s1769_s3 + $0x60] sm:$0xf] %vm893_vm2, %v1115_v3  ;;  %v1116_v11 = vpack.c.bf16 %v482_v5, %v482_v5  ;;  %950 = vst.msk [vmem:[%s1769_s3 + $0xe0] sm:$0xf] %vm893_vm2, %v1147_v7  ;;  %v1148_v12 = vpack.c.bf16 %v610_v9, %v610_v9 }
 0x110   :  { %921 = vst.msk [vmem:[%s1769_s3 + $0x6c] sm:$0xf] %vm893_vm2, %v1118_v8  ;;  %953 = vst.msk [vmem:[%s1769_s3 + $0xec] sm:$0xf] %vm893_vm2, %v1150_v10 }
 0x111   :  { %919 = vst.msk [vmem:[%s1769_s3 + $0x64] sm:$0xf] %vm893_vm2, %v1116_v11  ;;  %v1220_v13 = vpop.f32.mrb[28].mxu0  ;;  %951 = vst.msk [vmem:[%s1769_s3 + $0xe4] sm:$0xf] %vm893_vm2, %v1148_v12  ;;  %v1252_v15 = vpop.f32.mrb[28].mxu1 }
 0x112   :  { %v503_v14 = vadd.f32 %v1220_v13, %v1444_v34  ;;  %v494_v16 = vpop.f32.mrb[29].mxu0  ;;  %v631_v17 = vadd.f32 %v1252_v15, %v1444_v34  ;;  %v622_v19 = vpop.f32.mrb[29].mxu1 }
 0x113   :  { %v495_v18 = vadd.f32 %v1444_v34, %v494_v16  ;;  %v1221_v20 = vpop.f32.mrb[30].mxu0  ;;  %v623_v22 = vadd.f32 %v1444_v34, %v622_v19  ;;  %v1253_v24 = vpop.f32.mrb[30].mxu1 }
 0x114   :  { %v1121_v21 = vpack.c.bf16 %v503_v14, %v503_v14  ;;  %v506_v23 = vadd.f32 %v1221_v20, %v1444_v34  ;;  %v497_v25 = vpop.f32.mrb[31].mxu0  ;;  %v1153_v26 = vpack.c.bf16 %v631_v17, %v631_v17  ;;  %v634_v28 = vadd.f32 %v1253_v24, %v1444_v34  ;;  %v625_v30 = vpop.f32.mrb[31].mxu1 }
 0x115   :  { %v1119_v27 = vpack.c.bf16 %v495_v18, %v495_v18  ;;  %v498_v29 = vadd.f32 %v1444_v34, %v497_v25  ;;  %v1151_v31 = vpack.c.bf16 %v623_v22, %v623_v22  ;;  %v626_v33 = vadd.f32 %v1444_v34, %v625_v30 }
 0x116   :  { %924 = vst.msk [vmem:[%s1769_s3 + $0x78] sm:$0xf] %vm893_vm2, %v1121_v21  ;;  %v1122_v32 = vpack.c.bf16 %v506_v23, %v506_v23  ;;  %956 = vst.msk [vmem:[%s1769_s3 + $0xf8] sm:$0xf] %vm893_vm2, %v1153_v26  ;;  %v1154_v35 = vpack.c.bf16 %v634_v28, %v634_v28 }
 0x117   :  { %922 = vst.msk [vmem:[%s1769_s3 + $0x70] sm:$0xf] %vm893_vm2, %v1119_v27  ;;  %v1120_v36 = vpack.c.bf16 %v498_v29, %v498_v29  ;;  %954 = vst.msk [vmem:[%s1769_s3 + $0xf0] sm:$0xf] %vm893_vm2, %v1151_v31  ;;  %v1152_v34 = vpack.c.bf16 %v626_v33, %v626_v33 }
 0x118   :  { %925 = vst.msk [vmem:[%s1769_s3 + $0x7c] sm:$0xf] %vm893_vm2, %v1122_v32  ;;  %957 = vst.msk [vmem:[%s1769_s3 + $0xfc] sm:$0xf] %vm893_vm2, %v1154_v35 }
 0x119   :  { %923 = vst.msk [vmem:[%s1769_s3 + $0x74] sm:$0xf] %vm893_vm2, %v1120_v36  ;;  %955 = vst.msk [vmem:[%s1769_s3 + $0xf4] sm:$0xf] %vm893_vm2, %v1152_v34 }

</bundles_post_ra>
